<compile_context>
chip_gen: v5e
topology: v5e:2x2
jax: 0.10.0
libtpu: 0.0.40
codegen_flags: <defaults>
</compile_context>

<pallas_src>
import numpy as np
import jax
import jax.numpy as jnp
from jax.experimental import pallas as pl
from jax.experimental.pallas import tpu as pltpu


def _add_bcast_kernel(x_ref, a_ref, o_ref):
    # x_ref: (tb, tl) rows of flattened (C*H*W) images; a_ref: (1, tl) grid slice.
    o_ref[...] = x_ref[...] + a_ref[...]


def make_grid(size):
    """Replicates GridGenerator.__init__ (vectorized, no Python loops).

    size = (H, W). Returns A of shape (2, H, W), float32:
      A[0, h, w] = -1 + w / (W - 1) * 2   (A2 transposed)
      A[1, h, w] = -1 + h / (H - 1) * 2   (A1)
    Degenerate sizes (H==1 or W==1) are guarded against divide-by-zero and
    collapse to -1 instead of NaN.
    """
    H, W = size
    wd = max(W - 1, 1)
    hd = max(H - 1, 1)
    w_vals = -1.0 + np.arange(W, dtype=np.float64) / wd * 2.0   # (W,)
    h_vals = -1.0 + np.arange(H, dtype=np.float64) / hd * 2.0   # (H,)
    a_w = np.broadcast_to(w_vals[None, :], (H, W))
    a_h = np.broadcast_to(h_vals[:, None], (H, W))
    A = np.stack([a_w, a_h], axis=0).astype(np.float32)          # (2, H, W)
    return jnp.asarray(A)


def _round_up(x, m):
    return (x + m - 1) // m * m


def _choose_tiles(N, L, elem_bytes, target_bytes=4 << 20):
    """Pick (tb, tl): (8,128)-aligned blocks, ~target_bytes of x per grid step.

    Fat sublane tile first so the (1, tl) A slice is a negligible fraction of
    per-step traffic; lane tile is full-L when that fits (A fully resident).
    Blocks need not divide N / L — the grid uses cdiv and Pallas masks the
    ragged edge block.
    """
    # Aim for a reasonably fat row tile before deciding whether to split lanes.
    min_tb = min(_round_up(N, 8), 64)
    if L <= 128 or L * elem_bytes * min_tb <= target_bytes:
        tl = L                                   # single lane block
    else:
        tl = (target_bytes // (min_tb * elem_bytes)) // 128 * 128
        tl = max(128, tl)
        if tl >= L:
            tl = L
    # Rows: as many (multiple of 8) as still fit the target with this tl.
    tb = max(8, (target_bytes // (tl * elem_bytes)) // 8 * 8)
    if tb >= N:
        tb = N                                   # full dim (legal for any N)
    # Best-effort megacore balance: avoid a single-step grid when N allows —
    # give the leading 'parallel' axis >= 2 (even) row steps.
    if tb == N and tl == L and N > 8:
        tb2 = _round_up(pl.cdiv(N, 2), 8)
        if tb2 < N:
            tb = tb2
    return tb, tl


def grid_generator_forward(x, A, *, min_pallas_bytes=1 << 20):
    """x: (N, C, H, W) float; A: (C, H, W) float -> x + A[None]."""
    N, C, H, W = x.shape
    assert A.shape == (C, H, W)
    total_bytes = x.size * x.dtype.itemsize
    if total_bytes < min_pallas_bytes:
        # KB-scale inputs: Pallas per-call/per-step overhead dominates; XLA's
        # fused broadcast-add is strictly faster here.
        return x + A[None, :, :, :]

    L = C * H * W
    xf = x.reshape(N, L)            # contiguous reshape: free layout plumbing
    af = A.reshape(1, L).astype(x.dtype)
    tb, tl = _choose_tiles(N, L, x.dtype.itemsize)
    ni = pl.cdiv(N, tb)
    nj = pl.cdiv(L, tl)

    if nj == 1:
        # Single lane block: A's block index is constant -> fetched once and
        # resident in VMEM for the whole call.
        out_flat = pl.pallas_call(
            _add_bcast_kernel,
            out_shape=jax.ShapeDtypeStruct((N, L), x.dtype),
            grid=(ni,),
            in_specs=[
                pl.BlockSpec((tb, tl), lambda i: (i, 0)),
                pl.BlockSpec((1, tl), lambda i: (0, 0)),
            ],
            out_specs=pl.BlockSpec((tb, tl), lambda i: (i, 0)),
            compiler_params=pltpu.CompilerParams(
                dimension_semantics=("parallel",),
                vmem_limit_bytes=32 << 20),
        )(xf, af)
    else:
        # Lane axis split: lane-block index j is the OUTER grid axis so A's
        # block index (0, j) is constant across the inner row axis and the
        # pipeline skips the redundant A re-fetch.
        out_flat = pl.pallas_call(
            _add_bcast_kernel,
            out_shape=jax.ShapeDtypeStruct((N, L), x.dtype),
            grid=(nj, ni),
            in_specs=[
                pl.BlockSpec((tb, tl), lambda j, i: (i, j)),
                pl.BlockSpec((1, tl), lambda j, i: (0, j)),
            ],
            out_specs=pl.BlockSpec((tb, tl), lambda j, i: (i, j)),
            compiler_params=pltpu.CompilerParams(
                dimension_semantics=("parallel", "parallel"),
                vmem_limit_bytes=32 << 20),
        )(xf, af)
        # NOTE: pipeline_mode=pl.Buffered(3) on x/out only if xprof shows
        # exposed DMA; neutral otherwise, so we keep the default 2-deep buffer.
    return out_flat.reshape(N, C, H, W)


if __name__ == "__main__":
    # Small test matching the module (channel dim must be 2 to match A).
    N, H, W = 2, 16, 16
    key = jax.random.PRNGKey(0)
    x = jax.random.normal(key, (N, 2, H, W), dtype=jnp.float32)
    A = make_grid((H, W))

    # Force the Pallas path (the default heuristic would bypass to XLA for a
    # 4 KiB input) so the kernel itself is exercised and checked.
    out = jax.block_until_ready(grid_generator_forward(x, A, min_pallas_bytes=0))
    ref = x + A[None, :, :, :]
    np.testing.assert_allclose(np.asarray(out), np.asarray(ref), rtol=1e-6, atol=1e-6)

    # Larger (MB-scale) shape that takes the tiled/pipelined path with
    # multiple grid steps and a resident A block.
    N2, H2, W2 = 16, 128, 256
    x2 = jax.random.normal(jax.random.PRNGKey(1), (N2, 2, H2, W2), dtype=jnp.float32)
    A2 = make_grid((H2, W2))
    out2 = jax.block_until_ready(grid_generator_forward(x2, A2))
    ref2 = x2 + A2[None, :, :, :]
    np.testing.assert_allclose(np.asarray(out2), np.asarray(ref2), rtol=1e-6, atol=1e-6)

    print("KERNEL_OK")
</pallas_src>

<mosaic_0001>
module attributes {stable_mosaic.version = 11 : i64} {
  func.func @_add_bcast_kernel(%arg0: i32, %arg1: memref<2x512xf32, #tpu.memory_space<vmem>>, %arg2: memref<1x512xf32, #tpu.memory_space<vmem>>, %arg3: memref<2x512xf32, #tpu.memory_space<vmem>>) attributes {dimension_semantics = [#tpu.dimension_semantics<parallel>], iteration_bounds = array<i64: 1>, scalar_prefetch = 0 : i64, scratch_operands = 0 : i64, tpu.core_type = #tpu.core_type<tc>, window_params = [{transform_indices = @transform_0, window_bounds = array<i64: 2, 512>}, {pipeline_mode = #tpu.pipeline_mode<synchronous>, transform_indices = @transform_1, window_bounds = array<i64: 1, 512>}, {transform_indices = @transform_2, window_bounds = array<i64: 2, 512>}]} {
    %c0 = arith.constant 0 : index
    %c0_0 = arith.constant 0 : index
    %0 = vector.load %arg1[%c0, %c0_0] : memref<2x512xf32, #tpu.memory_space<vmem>>, vector<2x512xf32>
    %c0_1 = arith.constant 0 : index
    %c0_2 = arith.constant 0 : index
    %1 = vector.load %arg2[%c0_1, %c0_2] : memref<1x512xf32, #tpu.memory_space<vmem>>, vector<1x512xf32>
    %2 = vector.broadcast %1 : vector<1x512xf32> to vector<2x512xf32>
    %3 = arith.addf %0, %2 : vector<2x512xf32>
    %c0_3 = arith.constant 0 : index
    %c0_4 = arith.constant 0 : index
    %4 = vector.load %arg3[%c0_3, %c0_4] : memref<2x512xf32, #tpu.memory_space<vmem>>, vector<2x512xf32>
    tpu.vector_store %arg3[%c0_3, %c0_4], %3 {strides = array<i32>} : memref<2x512xf32, #tpu.memory_space<vmem>>, vector<2x512xf32>,
    return
  }
  func.func @transform_0(%arg0: i32) -> (i32, i32) {
    %c0_i32 = arith.constant 0 : i32
    %c0_i32_0 = arith.constant 0 : i32
    return %arg0, %c0_i32 : i32, i32
  }
  func.func @transform_1(%arg0: i32) -> (i32, i32) {
    %c0_i32 = arith.constant 0 : i32
    %c0_i32_0 = arith.constant 0 : i32
    %c0_i32_1 = arith.constant 0 : i32
    return %c0_i32, %c0_i32_0 : i32, i32
  }
  func.func @transform_2(%arg0: i32) -> (i32, i32) {
    %c0_i32 = arith.constant 0 : i32
    %c0_i32_0 = arith.constant 0 : i32
    return %arg0, %c0_i32 : i32, i32
  }
}

</mosaic_0001>

<bundles_post_ra>
// kernel: tpu_custom_call.1
= control target key start
LH: loop header
LB: loop body
LE: loop exit
PB: predicated region body
PF: predicated region fallthrough
CT: control target
= control target key end

     0   :  { %7 = vsyncpa [#allocation3], 0  ;;  %s185_s0 = inlined_call_operand.hbm [shape: f32[2,512], index: 0, kind: input, shape index: {}]   ;;  %s186_s1 = inlined_call_operand.hbm [shape: f32[1,512], index: 1, kind: input, shape index: {}]   ;;  %s187_s2 = inlined_call_operand.hbm [shape: f32[2,512], index: 2, kind: output, shape index: {}]  }
   0x1   :  { %8 = vsyncpa [#allocation6], 0 }
   0x2   :  { %9 = vsyncpa [#allocation4], 0  ;;  %s15_s11 = sshll.u32 %s185_s0, 4  ;;  %s158_s12 = smov [#allocation2]   ;;  %s16_s11 = int_to_ptr.hbm [resolvable:$true] %s15_s11 }
   0x3   :  { %s17_s13 = sshll.u32 %s158_s12, 4  ;;  %s26_s16 = sshll.u32 %s186_s1, 4  ;;  %s18_s13 = int_to_ptr.vmem [resolvable:$true] %s17_s13  ;;  %s27_s16 = int_to_ptr.hbm [resolvable:$true] %s26_s16 }
   0x4   :  { %20 = dma.hbm_to_vmem [thread:$0]  %s16_s11, 128, %s18_s13, [#allocation3]  }
   0x5   :  { %s159_s17 = smov [#allocation5]  }
   0x6   :  { %s28_s18 = sshll.u32 %s159_s17, 4  ;;  %s29_s18 = int_to_ptr.vmem [resolvable:$true] %s28_s18 }
   0x7   :  { %31 = dma.hbm_to_vmem [thread:$0]  %s27_s16, 64, %s29_s18, [#allocation6]  }
   0x8   :  { %152 = dma.done.wait [#allocation3], 128  }
   0x9   :  { %153 = vsyncadd [#allocation3], 4294967168 }
   0xa   :  { %154 = dma.done.wait [#allocation6], 64  }
   0xb   :  { %155 = vsyncadd [#allocation6], 4294967232  ;;  %v41_v0 = vld [vmem:[#allocation5] sm:$0xf]  ;;  %vm50_vm0 = vcmask 1041408   ;;  %vm52_vm1 = vcmask 1045508  }
   0xc   :  { %v43_v1 = vperm.slane %v41_v0, 0  ;;  %v44_v2 = vperm.slane %v41_v0, 1  ;;  %v45_v3 = vperm.slane %v41_v0, 2  ;;  %v46_v4 = vperm.slane %v41_v0, 3  ;;  %v40_v8 = vld [vmem:[#allocation2] sm:$0xff]  ;;  %s160_s0 = smov [#allocation7]  }
   0xd   :  { %vm54_vm2 = vcmask 1043456   ;;  %s64_s1 = sshll.u32 %s160_s0, 4  ;;  %s66_s21 = sshll.u32 %s187_s2, 4  ;;  %s65_s1 = int_to_ptr.vmem [resolvable:$true] %s64_s1  ;;  %s67_s21 = int_to_ptr.hbm [resolvable:$true] %s66_s21 }
   0xe   :  { %v47_v5 = vrot.slane %v44_v2, 6  ;;  %v48_v6 = vrot.slane %v45_v3, 4  ;;  %v49_v7 = vrot.slane %v46_v4, 2 }
  0x10   :  { %v51_v9 = vsel %vm50_vm0, %v43_v1, %v47_v5  ;;  %v53_v10 = vsel %vm52_vm1, %v48_v6, %v49_v7 }
  0x11   :  { %v55_v11 = vsel %vm54_vm2, %v51_v9, %v53_v10 }
  0x12   :  { %v57_v12 = vadd.f32 %v55_v11, %v40_v8 }
  0x14   :  { %58 = vst [vmem:[#allocation7] sm:$0xff] %v57_v12 }
  0x15   :  { %69 = dma.vmem_to_hbm [thread:$0]  %s65_s1, 128, %s67_s21, [#allocation4]  }
  0x16   :  { %156 = dma.done.wait [#allocation4], 128  }
  0x17   :  { %157 = vsyncadd [#allocation4], 4294967168 }
  0x18   :  { %74 = vsyncpa [#allocation3], 1 }
  0x19   :  { %75 = vsyncpa [#allocation6], 1 }
  0x1a   :  { %76 = vsyncpa [#allocation4], 1 }

</bundles_post_ra>
